<compile_context>
chip_gen: v6e
topology: v6e:2x2x1
jax: 0.10.0
libtpu: 0.0.40
codegen_flags: <defaults>
</compile_context>

<pallas_src>
import numpy as np
import jax
import jax.numpy as jnp
from jax import lax
from jax.experimental import pallas as pl
from jax.experimental.pallas import tpu as pltpu

_NUM_COLS = 24
_PACK = 16                                   # rows packed per lane-dense row
_PACKED_COLS = _NUM_COLS * _PACK             # 384 = 3 * 128 lanes
_TARGET_BLOCK_BYTES = 4 * 1024 * 1024        # ~4 MiB per input block (v5e/v6e/v7x compromise)
_VMEM_LIMIT_BYTES = 40 * 1024 * 1024         # 3 bufs x 2 inputs x ~4.2 MiB ~= 25 MiB + headroom

# Memo: does this jax / device accept BlockSpec(pipeline_mode=pl.Buffered(3))?
_buffered_ok = hasattr(pl, "Buffered")


def _weights_f32():
    a = np.array([1.5] * 4 + [2.0] * 7 + [3.0] * 7 + [4.0] * 6, dtype=np.float64)
    logs = np.log(np.arange(1, _NUM_COLS + 1, dtype=np.float64))
    return jnp.asarray((a * logs / np.sum(a * logs)).astype(np.float32))


def _make_sumsq_kernel(*, tm, cp, acc_rows, t_per, n_rows, need_mask):
    """Accumulate per-packed-column sums of squared differences into (acc_rows, cp)."""

    def kernel(x_ref, y_ref, out_ref):
        p = pl.program_id(0)
        i = pl.program_id(1)

        @pl.when(i == 0)
        def _():
            out_ref[...] = jnp.zeros_like(out_ref)

        # In-kernel upcast (supports bf16/f16 inputs with no extra HBM pass).
        diff = y_ref[...].astype(jnp.float32) - x_ref[...].astype(jnp.float32)

        if need_mask:
            # Mask BEFORE squaring: OOB rows of a ragged/overflow tile may hold
            # Inf/NaN garbage; select-then-square keeps them out of the
            # accumulator (0 * NaN after the square would poison it).
            row0 = (p * t_per + i) * tm
            rid = lax.broadcasted_iota(jnp.int32, (tm, cp), 0)
            diff = jnp.where(rid < (n_rows - row0), diff, 0.0)

        sq = diff * diff
        if tm == acc_rows:
            out_ref[...] += sq
        else:
            # Fold tm rows onto the 8-row accumulator with pure VPU adds; the
            # reshape is (8,128)-tile aligned -> no data movement, no XLU.
            out_ref[...] += sq.reshape(tm // acc_rows, acc_rows, cp).sum(axis=0)

    return kernel


def _sumsq_partials(xp, yp, *, tm, cp, acc_rows, p_split, t_per, t_total,
                    n_rows, need_mask, need_clamp, use_buffered):
    kernel = _make_sumsq_kernel(tm=tm, cp=cp, acc_rows=acc_rows, t_per=t_per,
                                n_rows=n_rows, need_mask=need_mask)

    if need_clamp:
        # The cdiv 2-way split can create one overflow tile; clamp its block
        # index in-bounds (its rows are fully masked inside the kernel).
        def in_map(p, i):
            return (jnp.minimum(p * t_per + i, t_total - 1), 0)
    else:
        def in_map(p, i):
            return (p * t_per + i, 0)

    def make_in_spec():
        if use_buffered:
            return pl.BlockSpec((tm, cp), in_map, pipeline_mode=pl.Buffered(3))
        return pl.BlockSpec((tm, cp), in_map)

    return pl.pallas_call(
        kernel,
        out_shape=jax.ShapeDtypeStruct((p_split, acc_rows, cp), jnp.float32),
        grid_spec=pltpu.PrefetchScalarGridSpec(
            num_scalar_prefetch=0,
            grid=(p_split, t_per),
            in_specs=[make_in_spec(), make_in_spec()],
            # Leading dim squeezed; output block resident across the reduction
            # axis -> acts as the accumulator.
            out_specs=pl.BlockSpec((None, acc_rows, cp), lambda p, i: (p, 0, 0)),
        ),
        compiler_params=pltpu.CompilerParams(
            dimension_semantics=("parallel", "arbitrary"),
            vmem_limit_bytes=_VMEM_LIMIT_BYTES,
        ),
        cost_estimate=pl.CostEstimate(
            flops=3 * n_rows * cp,
            transcendentals=0,
            bytes_accessed=int(xp.size * xp.dtype.itemsize
                               + yp.size * yp.dtype.itemsize
                               + p_split * acc_rows * cp * 4),
        ),
    )(xp, yp)


def _run_sumsq(xp, yp, **kw):
    """Call the kernel, preferring triple-buffered inputs, with a safe fallback."""
    global _buffered_ok
    if _buffered_ok:
        try:
            out = _sumsq_partials(xp, yp, use_buffered=True, **kw)
            jax.block_until_ready(out)       # surface any deferred compile error here
            return out
        except Exception:
            _buffered_ok = False             # pipeline_mode rejected: use default 2-deep
    return _sumsq_partials(xp, yp, use_buffered=False, **kw)


def my_loss(x, y, *, block_rows=None):
    """preds x, label y: (N, 24). Returns the scalar weighted-RMSE score (f32)."""
    assert x.shape == y.shape and x.ndim == 2 and x.shape[1] == _NUM_COLS
    n = x.shape[0]

    cp = _PACKED_COLS
    n_rows = n // _PACK
    n_main = n_rows * _PACK

    col_sumsq = jnp.zeros((_NUM_COLS,), jnp.float32)

    if n_rows > 0:
        # Lane-dense view of the bulk: (n_main, 24) -> (n_rows, 384), row-major.
        # When N % 16 == 0 the slice is the identity (no copy).
        xm = x if n_main == n else x[:n_main]
        ym = y if n_main == n else y[:n_main]
        xp = xm.reshape(n_rows, cp)
        yp = ym.reshape(n_rows, cp)

        # ---- dtype- and lane-padding-aware row-tile size ---------------------
        itemsize = int(np.dtype(x.dtype).itemsize)
        row_align = 8 * max(1, 4 // itemsize)            # 8 f32 / 16 bf16 / 32 int8
        padded_cols = ((cp + 127) // 128) * 128          # VMEM pads last dim to 128 lanes
        if block_rows is None:
            tm = _TARGET_BLOCK_BYTES // (padded_cols * itemsize)
        else:
            tm = int(block_rows)
        tm = max(row_align, (tm // row_align) * row_align)
        if tm >= n_rows:
            if n_rows >= 2 * row_align:
                # Whole bulk fits one block: still split into two row-tiles so
                # both v7x TensorCores get work (harmless on single-TC chips).
                tm = ((-(-n_rows // 2)) + row_align - 1) // row_align * row_align
            else:
                tm = n_rows                              # full-extent block (legal)

        t_total = -(-n_rows // tm)
        p_split = 2 if t_total >= 2 else 1               # guaranteed 2-way split
        t_per = -(-t_total // p_split)                   # cdiv: never drops a core
        acc_rows = 8 if tm % 8 == 0 else tm
        need_clamp = (p_split * t_per != t_total)        # overflow tile on odd t_total
        need_mask = (p_split * t_per * tm != n_rows)     # ragged tail / overflow rows

        partials = _run_sumsq(
            xp, yp, tm=tm, cp=cp, acc_rows=acc_rows, p_split=p_split,
            t_per=t_per, t_total=t_total, n_rows=n_rows,
            need_mask=need_mask, need_clamp=need_clamp)

        # Fold (p_split, acc_rows, 384) -> per-column sums (16 packed rows x 24 cols).
        col_sumsq = partials.sum(axis=(0, 1)).reshape(_PACK, _NUM_COLS).sum(axis=0)

    if n_main < n:
        # <= 15 remainder rows (~1 KB): folded here by XLA instead of padding
        # or running a lane-masked kernel.
        dt = y[n_main:].astype(jnp.float32) - x[n_main:].astype(jnp.float32)
        col_sumsq = col_sumsq + jnp.sum(dt * dt, axis=0)

    # ---- tiny finalize (~100 flops): RMSE per column, weighted dot ----------
    rmse = jnp.sqrt(col_sumsq / jnp.float32(n))
    return jnp.sum(rmse * _weights_f32())

# TODO(synk): My_loss.coreff() is dead code (never called by forward); not implemented.


def _reference(x, y):
    # Pure-JAX reference matching the PyTorch forward.
    a = np.array([1.5] * 4 + [2.0] * 7 + [3.0] * 7 + [4.0] * 6, dtype=np.float64)
    logs = np.log(np.arange(1, _NUM_COLS + 1, dtype=np.float64))
    w = jnp.asarray((a * logs / np.sum(a * logs)).astype(np.float32))
    rmse = jnp.sqrt(jnp.sum((y - x) ** 2, axis=0) / x.shape[0])
    return jnp.sum(rmse * w)


if __name__ == "__main__":
    key = jax.random.PRNGKey(0)

    # (N, block_rows override) — small shapes exercising every code path:
    checks = [
        (64, None),     # N % 16 == 0, bulk fits a single full-extent block
        (37, None),     # tiny bulk (2 packed rows) + 5-row XLA tail
        (7, None),      # no bulk at all: pure XLA-tail path
        (200, 8),       # ragged last tile + 2-way split + 8-row XLA tail
        (384, 8),       # odd tile count: clamped+masked overflow tile on the split
        (2048, None),   # auto 2-way split of a single-block-sized bulk
        (4096, 64),     # multi-step accumulation + 8-row fold, clean 2-way split
    ]
    for n, br in checks:
        key, kx, ky = jax.random.split(key, 3)
        x = jax.random.normal(kx, (n, _NUM_COLS), dtype=jnp.float32)   # preds
        y = jax.random.normal(ky, (n, _NUM_COLS), dtype=jnp.float32)   # label
        out = my_loss(x, y, block_rows=br)
        jax.block_until_ready(out)
        ref = _reference(x, y)
        np.testing.assert_allclose(np.asarray(out), np.asarray(ref),
                                   rtol=5e-5, atol=1e-6)

    print("KERNEL_OK")
</pallas_src>

<mosaic_0001>
module attributes {stable_mosaic.version = 11 : i64} {
  func.func @kernel(%arg0: i32, %arg1: i32, %arg2: memref<4x384xf32, #tpu.memory_space<vmem>>, %arg3: memref<4x384xf32, #tpu.memory_space<vmem>>, %arg4: memref<1x4x384xf32, #tpu.memory_space<vmem>>) attributes {dimension_semantics = [#tpu.dimension_semantics<parallel>, #tpu.dimension_semantics<arbitrary>], iteration_bounds = array<i64: 1, 1>, scalar_prefetch = 0 : i64, scratch_operands = 0 : i64, tpu.core_type = #tpu.core_type<tc>, window_params = [{transform_indices = @transform_0, window_bounds = array<i64: 4, 384>}, {transform_indices = @transform_1, window_bounds = array<i64: 4, 384>}, {transform_indices = @transform_2, window_bounds = array<i64: 1, 4, 384>}]} {
    %c0_i32 = arith.constant 0 : i32
    %0 = arith.cmpi eq, %arg1, %c0_i32 : i32
    %1 = arith.extui %0 : i1 to i32
    %c0_i32_0 = arith.constant 0 : i32
    %2 = arith.cmpi ne, %1, %c0_i32_0 : i32
    scf.if %2 {
      %cst = arith.constant 0.000000e+00 : f32
      %13 = vector.broadcast %cst : f32 to vector<4x384xf32>
      %c0_10 = arith.constant 0 : index
      %c0_11 = arith.constant 0 : index
      %c0_12 = arith.constant 0 : index
      %14 = vector.load %arg4[%c0_10, %c0_11, %c0_12] : memref<1x4x384xf32, #tpu.memory_space<vmem>>, vector<1x4x384xf32>
      %15 = vector.shape_cast %14 : vector<1x4x384xf32> to vector<4x384xf32>
      %16 = vector.shape_cast %13 : vector<4x384xf32> to vector<1x4x384xf32>
      tpu.vector_store %arg4[%c0_10, %c0_11, %c0_12], %16 {strides = array<i32>} : memref<1x4x384xf32, #tpu.memory_space<vmem>>, vector<1x4x384xf32>,
    } else {
    }
    %c0 = arith.constant 0 : index
    %c0_1 = arith.constant 0 : index
    %3 = vector.load %arg3[%c0, %c0_1] : memref<4x384xf32, #tpu.memory_space<vmem>>, vector<4x384xf32>
    %c0_2 = arith.constant 0 : index
    %c0_3 = arith.constant 0 : index
    %4 = vector.load %arg2[%c0_2, %c0_3] : memref<4x384xf32, #tpu.memory_space<vmem>>, vector<4x384xf32>
    %5 = arith.subf %3, %4 : vector<4x384xf32>
    %6 = arith.mulf %5, %5 : vector<4x384xf32>
    %c0_4 = arith.constant 0 : index
    %c0_5 = arith.constant 0 : index
    %c0_6 = arith.constant 0 : index
    %7 = vector.load %arg4[%c0_4, %c0_5, %c0_6] : memref<1x4x384xf32, #tpu.memory_space<vmem>>, vector<1x4x384xf32>
    %8 = vector.shape_cast %7 : vector<1x4x384xf32> to vector<4x384xf32>
    %9 = arith.addf %8, %6 : vector<4x384xf32>
    %c0_7 = arith.constant 0 : index
    %c0_8 = arith.constant 0 : index
    %c0_9 = arith.constant 0 : index
    %10 = vector.load %arg4[%c0_7, %c0_8, %c0_9] : memref<1x4x384xf32, #tpu.memory_space<vmem>>, vector<1x4x384xf32>
    %11 = vector.shape_cast %10 : vector<1x4x384xf32> to vector<4x384xf32>
    %12 = vector.shape_cast %9 : vector<4x384xf32> to vector<1x4x384xf32>
    tpu.vector_store %arg4[%c0_7, %c0_8, %c0_9], %12 {strides = array<i32>} : memref<1x4x384xf32, #tpu.memory_space<vmem>>, vector<1x4x384xf32>,
    return
  }
  func.func @transform_0(%arg0: i32, %arg1: i32) -> (i32, i32) {
    %c1_i32 = arith.constant 1 : i32
    %0 = arith.muli %arg0, %c1_i32 : i32
    %1 = arith.addi %0, %arg1 : i32
    %c0_i32 = arith.constant 0 : i32
    %c0_i32_0 = arith.constant 0 : i32
    return %1, %c0_i32 : i32, i32
  }
  func.func @transform_1(%arg0: i32, %arg1: i32) -> (i32, i32) {
    %c1_i32 = arith.constant 1 : i32
    %0 = arith.muli %arg0, %c1_i32 : i32
    %1 = arith.addi %0, %arg1 : i32
    %c0_i32 = arith.constant 0 : i32
    %c0_i32_0 = arith.constant 0 : i32
    return %1, %c0_i32 : i32, i32
  }
  func.func @transform_2(%arg0: i32, %arg1: i32) -> (i32, i32, i32) {
    %c0_i32 = arith.constant 0 : i32
    %c0_i32_0 = arith.constant 0 : i32
    %c0_i32_1 = arith.constant 0 : i32
    return %arg0, %c0_i32, %c0_i32_0 : i32, i32, i32
  }
}

</mosaic_0001>

<bundles_post_ra>
// kernel: tpu_custom_call.1
= control target key start
LH: loop header
LB: loop body
LE: loop exit
PB: predicated region body
PF: predicated region fallthrough
CT: control target
= control target key end

     0   :  { %7 = vsyncpa [#allocation3], 0  ;;  %s180_s0 = inlined_call_operand.hbm [shape: f32[4,384], index: 0, kind: input, shape index: {}]   ;;  %s181_s1 = inlined_call_operand.hbm [shape: f32[4,384], index: 1, kind: input, shape index: {}]   ;;  %s182_s2 = inlined_call_operand.hbm [shape: f32[1,4,384], index: 2, kind: output, shape index: {}]  }
   0x1   :  { %8 = vsyncpa [#allocation6], 0 }
   0x2   :  { %9 = vsyncpa [#allocation4], 0  ;;  %s152_s9 = smov [#allocation2]   ;;  %s153_s11 = smov [#allocation5]  }
   0x3   :  { %s20_s10 = sshll.u32 %s152_s9, 4  ;;  %s34_s12 = sshll.u32 %s153_s11, 4  ;;  %s21_s10 = int_to_ptr.vmem [resolvable:$true] %s20_s10  ;;  %s35_s12 = int_to_ptr.vmem [resolvable:$true] %s34_s12 }
   0x4   :  { %s94_s13 = scalar_lea.vmem %s21_s10, 192  ;;  %p99_p1 = scmp.lt.s32.totalorder %s21_s10, %s21_s10 }
   0x5   :  { %p95_p0 = scmp.ne.s32.totalorder %s21_s10, %s94_s13  ;;  %p100_p2 = scmp.lt.s32.totalorder %s94_s13, %s94_s13 }
   0x7   :  { %p101_p3 = por %p100_p2, %p99_p1 }
   0x9   :  { %p102_p4 = pnand %p101_p3, %p95_p0 }
   0xb   :  { %105 = shalt.err (!%p102_p4)
}
   0xc   :  { %23 = dma.hbm_to_vmem [thread:$0]  %s180_s0, 192, %s21_s10, [#allocation3]  }
   0xd   :  { %s114_s16 = scalar_lea.vmem %s35_s12, 192  ;;  %p119_p6 = scmp.lt.s32.totalorder %s35_s12, %s35_s12 }
   0xe   :  { %p115_p5 = scmp.ne.s32.totalorder %s35_s12, %s114_s16  ;;  %p120_p7 = scmp.lt.s32.totalorder %s114_s16, %s114_s16 }
  0x10   :  { %p121_p8 = por %p120_p7, %p119_p6 }
  0x12   :  { %p122_p9 = pnand %p121_p8, %p115_p5 }
  0x14   :  { %125 = shalt.err (!%p122_p9)
}
  0x15   :  { %37 = dma.hbm_to_vmem [thread:$0]  %s181_s1, 192, %s35_s12, [#allocation6]  }
  0x16   :  { %146 = dma.done.wait [#allocation3], 192  }
  0x17   :  { %147 = vsyncadd [#allocation3], 4294967104 }
  0x18   :  { %148 = dma.done.wait [#allocation6], 192  }
  0x19   :  { %149 = vsyncadd [#allocation6], 4294967104  ;;  %v154_v0 = vmov 0.0   ;;  %v52_v1 = vld [vmem:[#allocation5] sm:$0xff]  ;;  %v54_v2 = vld [vmem:[#allocation2] sm:$0xff]  ;;  %s155_s0 = smov [#allocation7]  }
  0x1a   :  { %51 = vst [vmem:[#allocation7 + $0x8] sm:$0xf] %v154_v0  ;;  %v53_v3 = vld [vmem:[#allocation5 + $0x8] sm:$0xf]  ;;  %v56_v4 = vsub.f32 %v52_v1, %v54_v2  ;;  %v55_v5 = vld [vmem:[#allocation2 + $0x8] sm:$0xf] }
  0x1b   :  { %v57_v6 = vsub.f32 %v53_v3, %v55_v5  ;;  %s72_s19 = sshll.u32 %s155_s0, 4  ;;  %s73_s19 = int_to_ptr.vmem [resolvable:$true] %s72_s19 }
  0x1c   :  { %v58_v7 = vmul.f32 %v56_v4, %v56_v4  ;;  %s126_s1 = scalar_lea.vmem %s73_s19, 192  ;;  %p131_p11 = scmp.lt.s32.totalorder %s73_s19, %s73_s19 }
  0x1d   :  { %v59_v9 = vmul.f32 %v57_v6, %v57_v6  ;;  %p127_p10 = scmp.ne.s32.totalorder %s73_s19, %s126_s1  ;;  %p132_p12 = scmp.lt.s32.totalorder %s126_s1, %s126_s1 }
  0x1e   :  { %64 = vst [vmem:[#allocation7] sm:$0xff] %v58_v7 }
  0x1f   :  { %p133_p13 = por %p132_p12, %p131_p11 }
  0x21   :  { %v61_v8 = vld [vmem:[#allocation7 + $0x8] sm:$0xf]  ;;  %p134_p0 = pnand %p133_p13, %p127_p10 }
  0x22   :  { %v63_v10 = vadd.f32 %v61_v8, %v59_v9 }
  0x24   :  { %65 = vst [vmem:[#allocation7 + $0x8] sm:$0xf] %v63_v10 }
  0x25   :  { %137 = shalt.err (!%p134_p0)
}
  0x26   :  { %75 = dma.vmem_to_hbm [thread:$0]  %s73_s19, 192, %s182_s2, [#allocation4]  }
  0x27   :  { %150 = dma.done.wait [#allocation4], 192  }
  0x28   :  { %151 = vsyncadd [#allocation4], 4294967104 }
  0x29   :  { %79 = vsyncpa [#allocation3], 1 }
  0x2a   :  { %80 = vsyncpa [#allocation6], 1 }
  0x2b   :  { %81 = vsyncpa [#allocation4], 1 }

</bundles_post_ra>
